<compile_context>
chip_gen: v7x
topology: tpu7x:2x2x1
jax: 0.10.0
libtpu: 0.0.40
codegen_flags: <defaults>
</compile_context>

<pallas_src>
import functools

import jax
import jax.numpy as jnp
from jax.experimental import pallas as pl
from jax.experimental.pallas import tpu as pltpu


def _round_up(x: int, m: int) -> int:
    return (x + m - 1) // m * m


def time_siren_kernel(xt_ref, w1_ref, w2_ref, b2_ref, ot_ref, *, bf16_sin=False):
    # xt_ref : (D_in, TB)  f32   -- batch tile on the lane axis (f32: no input quant)
    # w1_ref : (E, D_in)   f32   -- lin1.weight (PyTorch layout)
    # w2_ref : (E, E)      bf16  -- lin2.weight (PyTorch layout)
    # b2_ref : (E, 1)      f32   -- lin2.bias as a column
    # ot_ref : (E, TB)     f32 or bf16 -- transposed output tile
    xt = xt_ref[...]
    w1 = w1_ref[...]
    d_in = xt.shape[0]

    # Layer 1 on the VPU: D_in broadcast FMAs in f32 (K is tiny; MXU would be
    # <2% utilized and would force a bf16 cast of the raw time input).
    pre = w1[:, 0:1] * xt[0:1, :]
    for k in range(1, d_in):
        pre = pre + w1[:, k : k + 1] * xt[k : k + 1, :]

    if bf16_sin:
        # v6e/v7x option: bf16 VALU halves the sin-polynomial slot pressure;
        # h is cast to bf16 for the second matmul anyway.
        h = jnp.sin(pre.astype(jnp.bfloat16))
    else:
        h = jnp.sin(pre)  # f32 sin (v5e has no bf16 VPU/EUP)

    out = jnp.dot(
        w2_ref[...], h.astype(w2_ref.dtype), preferred_element_type=jnp.float32
    ) + b2_ref[...]
    ot_ref[...] = out.astype(ot_ref.dtype)


def time_siren(x, w1, w2, b2, *, b_tile=16384, out_dtype=jnp.float32,
               transposed_output=False, bf16_sin=False):
    """SIREN time embedding: sin(x @ w1.T) @ w2.T + b2.

    x : (B, input_dim) float32
    w1: (emb_dim, input_dim)  -- PyTorch lin1.weight
    w2: (emb_dim, emb_dim)    -- PyTorch lin2.weight
    b2: (emb_dim,)            -- PyTorch lin2.bias

    Returns (B, emb_dim) by default; with transposed_output=True returns the
    kernel-native (emb_dim, B) layout so a consumer dot_general can absorb the
    transpose (skips a full read+write pass over the output).
    """
    B, d_in = x.shape
    E = w1.shape[0]
    out_dtype = jnp.dtype(out_dtype)

    # Lane-dense batch tile: multiple of 128, large by default so the
    # ~0.35 us/step pipeline overhead is amortized (step-overhead-bound at
    # small tiles).  Small B collapses to a single tile automatically.
    tb = _round_up(min(int(b_tile), _round_up(B, 128)), 128)
    B_pad = _round_up(B, tb)
    n_tiles = B_pad // tb

    # f32 activations (no bf16 quantization of the time input), bf16 W2 for
    # the MXU, f32 bias column.
    x_pad = jnp.pad(x.astype(jnp.float32), ((0, B_pad - B), (0, 0)))
    xt = x_pad.T                                      # (D_in, B_pad) f32
    w1_f = w1.astype(jnp.float32)                     # (E, D_in)
    w2_bf = w2.astype(jnp.bfloat16)                   # (E, E)
    b2_col = b2.astype(jnp.float32).reshape(E, 1)     # (E, 1)

    cost = pl.CostEstimate(
        flops=2 * B_pad * (d_in * E + E * E),
        transcendentals=B_pad * E,
        bytes_accessed=(4 * d_in * B_pad                       # xt  (f32)
                        + 4 * E * d_in                         # w1  (f32)
                        + 2 * E * E                            # w2  (bf16)
                        + 4 * E                                # b2  (f32)
                        + out_dtype.itemsize * E * B_pad),     # out
    )

    # Explicit scoped-VMEM budget: double-buffered xt/out blocks plus f32/bf16
    # temporaries fit in 32 MiB for tb up to ~32K on every generation
    # (v5e default is only 16 MiB; v7x physical is 64 MiB).
    vmem_limit_bytes = 32 * 1024 * 1024

    out_t = pl.pallas_call(
        functools.partial(time_siren_kernel, bf16_sin=bf16_sin),
        out_shape=jax.ShapeDtypeStruct((E, B_pad), out_dtype),
        grid_spec=pltpu.PrefetchScalarGridSpec(
            num_scalar_prefetch=0,
            grid=(n_tiles,),
            in_specs=[
                pl.BlockSpec((d_in, tb), lambda i: (0, i)),   # x^T tile
                pl.BlockSpec((E, d_in), lambda i: (0, 0)),    # w1 (resident)
                pl.BlockSpec((E, E), lambda i: (0, 0)),       # w2 (resident)
                pl.BlockSpec((E, 1), lambda i: (0, 0)),       # b2 (resident)
            ],
            out_specs=pl.BlockSpec((E, tb), lambda i: (0, i)),
        ),
        compiler_params=pltpu.CompilerParams(
            dimension_semantics=("parallel",),   # megacore-shard batch on v7x
            vmem_limit_bytes=vmem_limit_bytes,
        ),
        cost_estimate=cost,
    )(xt, w1_f, w2_bf, b2_col)

    if transposed_output:
        return out_t[:, :B]       # (E, B): let the consumer absorb the transpose
    return out_t[:, :B].T         # (B, E): matches the PyTorch module


def reference_time_siren_f32(x, w1, w2, b2):
    h = jnp.sin(x @ w1.T)
    return h @ w2.T + b2[None, :]


def reference_time_siren_kernel_numerics(x, w1, w2, b2):
    # Emulates the kernel: f32 layer 1 + f32 sin, bf16 MXU layer 2 with f32 acc.
    h = jnp.sin(jnp.dot(x.astype(jnp.float32), w1.T.astype(jnp.float32)))
    return jnp.dot(h.astype(jnp.bfloat16), w2.T.astype(jnp.bfloat16),
                   preferred_element_type=jnp.float32) + b2[None, :]


if __name__ == "__main__":
    input_dim, emb_dim = 4, 32

    key = jax.random.PRNGKey(0)
    kx, kw1, kw2, kb2, kx2 = jax.random.split(key, 5)

    # Parameters in native PyTorch layouts:
    #   lin1.weight (E, D_in), lin2.weight (E, E), lin2.bias (E,)
    w1 = jax.random.normal(kw1, (emb_dim, input_dim), dtype=jnp.float32) * 0.5
    w2 = jax.random.normal(kw2, (emb_dim, emb_dim), dtype=jnp.float32) * 0.1
    b2 = jax.random.normal(kb2, (emb_dim,), dtype=jnp.float32) * 0.01

    # --- small shape (matches the module's typical use) ---
    batch = 8
    x = jax.random.normal(kx, (batch, input_dim), dtype=jnp.float32)
    out = jax.block_until_ready(time_siren(x, w1, w2, b2))
    assert out.shape == (batch, emb_dim)
    assert jnp.allclose(out, reference_time_siren_kernel_numerics(x, w1, w2, b2),
                        atol=2e-3, rtol=2e-3)
    assert jnp.allclose(out, reference_time_siren_f32(x, w1, w2, b2),
                        atol=2e-2, rtol=2e-2)

    # --- larger, non-multiple batch with a small tile: exercises padding +
    #     a multi-step grid (n_tiles=2) ---
    batch2 = 1000
    x2 = jax.random.normal(kx2, (batch2, input_dim), dtype=jnp.float32)
    out2 = jax.block_until_ready(time_siren(x2, w1, w2, b2, b_tile=512))
    assert out2.shape == (batch2, emb_dim)
    assert jnp.allclose(out2, reference_time_siren_kernel_numerics(x2, w1, w2, b2),
                        atol=2e-3, rtol=2e-3)
    assert jnp.allclose(out2, reference_time_siren_f32(x2, w1, w2, b2),
                        atol=2e-2, rtol=2e-2)

    # --- consumer-friendly fast path: transposed (E, B) bf16 output ---
    out3 = jax.block_until_ready(
        time_siren(x2, w1, w2, b2, out_dtype=jnp.bfloat16, transposed_output=True))
    assert out3.shape == (emb_dim, batch2)
    assert jnp.allclose(out3.astype(jnp.float32).T,
                        reference_time_siren_f32(x2, w1, w2, b2),
                        atol=4e-2, rtol=4e-2)

    print("KERNEL_OK")
</pallas_src>

<mosaic_0001>
module attributes {stable_mosaic.version = 11 : i64} {
  func.func @time_siren_kernel(%arg0: i32, %arg1: memref<4x128xf32, #tpu.memory_space<vmem>>, %arg2: memref<32x4xf32, #tpu.memory_space<vmem>>, %arg3: memref<32x32xbf16, #tpu.memory_space<vmem>>, %arg4: memref<32x1xf32, #tpu.memory_space<vmem>>, %arg5: memref<32x128xf32, #tpu.memory_space<vmem>>) attributes {dimension_semantics = [#tpu.dimension_semantics<parallel>], iteration_bounds = array<i64: 1>, scalar_prefetch = 0 : i64, scratch_operands = 0 : i64, tpu.core_type = #tpu.core_type<tc>, window_params = [{transform_indices = @transform_0, window_bounds = array<i64: 4, 128>}, {pipeline_mode = #tpu.pipeline_mode<synchronous>, transform_indices = @transform_1, window_bounds = array<i64: 32, 4>}, {pipeline_mode = #tpu.pipeline_mode<synchronous>, transform_indices = @transform_2, window_bounds = array<i64: 32, 32>}, {pipeline_mode = #tpu.pipeline_mode<synchronous>, transform_indices = @transform_3, window_bounds = array<i64: 32, 1>}, {transform_indices = @transform_4, window_bounds = array<i64: 32, 128>}]} {
    %c0 = arith.constant 0 : index
    %c0_0 = arith.constant 0 : index
    %0 = vector.load %arg1[%c0, %c0_0] : memref<4x128xf32, #tpu.memory_space<vmem>>, vector<4x128xf32>
    %c0_1 = arith.constant 0 : index
    %c0_2 = arith.constant 0 : index
    %1 = vector.load %arg2[%c0_1, %c0_2] : memref<32x4xf32, #tpu.memory_space<vmem>>, vector<32x4xf32>
    %2 = vector.extract_strided_slice %1 {offsets = [0, 0], sizes = [32, 1], strides = [1, 1]} : vector<32x4xf32> to vector<32x1xf32>
    %3 = vector.extract_strided_slice %0 {offsets = [0, 0], sizes = [1, 128], strides = [1, 1]} : vector<4x128xf32> to vector<1x128xf32>
    %4 = vector.broadcast %2 : vector<32x1xf32> to vector<32x128xf32>
    %5 = vector.broadcast %3 : vector<1x128xf32> to vector<32x128xf32>
    %6 = arith.mulf %4, %5 : vector<32x128xf32>
    %7 = vector.extract_strided_slice %1 {offsets = [0, 1], sizes = [32, 1], strides = [1, 1]} : vector<32x4xf32> to vector<32x1xf32>
    %8 = vector.extract_strided_slice %0 {offsets = [1, 0], sizes = [1, 128], strides = [1, 1]} : vector<4x128xf32> to vector<1x128xf32>
    %9 = vector.broadcast %7 : vector<32x1xf32> to vector<32x128xf32>
    %10 = vector.broadcast %8 : vector<1x128xf32> to vector<32x128xf32>
    %11 = arith.mulf %9, %10 : vector<32x128xf32>
    %12 = arith.addf %6, %11 : vector<32x128xf32>
    %13 = vector.extract_strided_slice %1 {offsets = [0, 2], sizes = [32, 1], strides = [1, 1]} : vector<32x4xf32> to vector<32x1xf32>
    %14 = vector.extract_strided_slice %0 {offsets = [2, 0], sizes = [1, 128], strides = [1, 1]} : vector<4x128xf32> to vector<1x128xf32>
    %15 = vector.broadcast %13 : vector<32x1xf32> to vector<32x128xf32>
    %16 = vector.broadcast %14 : vector<1x128xf32> to vector<32x128xf32>
    %17 = arith.mulf %15, %16 : vector<32x128xf32>
    %18 = arith.addf %12, %17 : vector<32x128xf32>
    %19 = vector.extract_strided_slice %1 {offsets = [0, 3], sizes = [32, 1], strides = [1, 1]} : vector<32x4xf32> to vector<32x1xf32>
    %20 = vector.extract_strided_slice %0 {offsets = [3, 0], sizes = [1, 128], strides = [1, 1]} : vector<4x128xf32> to vector<1x128xf32>
    %21 = vector.broadcast %19 : vector<32x1xf32> to vector<32x128xf32>
    %22 = vector.broadcast %20 : vector<1x128xf32> to vector<32x128xf32>
    %23 = arith.mulf %21, %22 : vector<32x128xf32>
    %24 = arith.addf %18, %23 : vector<32x128xf32>
    %25 = math.sin %24 : vector<32x128xf32>
    %c0_3 = arith.constant 0 : index
    %c0_4 = arith.constant 0 : index
    %26 = vector.load %arg3[%c0_3, %c0_4] : memref<32x32xbf16, #tpu.memory_space<vmem>>, vector<32x32xbf16>
    %27 = arith.truncf %25 : vector<32x128xf32> to vector<32x128xbf16>
    %cst = arith.constant dense<0.000000e+00> : vector<32x128xf32>
    %28 = tpu.matmul %26, %27, %cst {dimension_numbers = #tpu.dot_dimension_numbers<[1], [0], [0], [1], [0, 0, 1, 1], [], []>} : vector<32x32xbf16>, vector<32x128xbf16>, vector<32x128xf32> -> vector<32x128xf32>
    %c0_5 = arith.constant 0 : index
    %c0_6 = arith.constant 0 : index
    %29 = vector.load %arg4[%c0_5, %c0_6] : memref<32x1xf32, #tpu.memory_space<vmem>>, vector<32x1xf32>
    %30 = vector.broadcast %29 : vector<32x1xf32> to vector<32x128xf32>
    %31 = arith.addf %28, %30 : vector<32x128xf32>
    %c0_7 = arith.constant 0 : index
    %c0_8 = arith.constant 0 : index
    %32 = vector.load %arg5[%c0_7, %c0_8] : memref<32x128xf32, #tpu.memory_space<vmem>>, vector<32x128xf32>
    tpu.vector_store %arg5[%c0_7, %c0_8], %31 {strides = array<i32>} : memref<32x128xf32, #tpu.memory_space<vmem>>, vector<32x128xf32>,
    return
  }
  func.func @transform_0(%arg0: i32) -> (i32, i32) {
    %c0_i32 = arith.constant 0 : i32
    %c0_i32_0 = arith.constant 0 : i32
    return %c0_i32, %arg0 : i32, i32
  }
  func.func @transform_1(%arg0: i32) -> (i32, i32) {
    %c0_i32 = arith.constant 0 : i32
    %c0_i32_0 = arith.constant 0 : i32
    %c0_i32_1 = arith.constant 0 : i32
    return %c0_i32, %c0_i32_0 : i32, i32
  }
  func.func @transform_2(%arg0: i32) -> (i32, i32) {
    %c0_i32 = arith.constant 0 : i32
    %c0_i32_0 = arith.constant 0 : i32
    %c0_i32_1 = arith.constant 0 : i32
    return %c0_i32, %c0_i32_0 : i32, i32
  }
  func.func @transform_3(%arg0: i32) -> (i32, i32) {
    %c0_i32 = arith.constant 0 : i32
    %c0_i32_0 = arith.constant 0 : i32
    %c0_i32_1 = arith.constant 0 : i32
    return %c0_i32, %c0_i32_0 : i32, i32
  }
  func.func @transform_4(%arg0: i32) -> (i32, i32) {
    %c0_i32 = arith.constant 0 : i32
    %c0_i32_0 = arith.constant 0 : i32
    return %c0_i32, %arg0 : i32, i32
  }
}

</mosaic_0001>

<bundles_post_ra>
// kernel: tpu_custom_call.1
= control target key start
LH: loop header
LB: loop body
LE: loop exit
PB: predicated region body
PF: predicated region fallthrough
CT: control target
= control target key end

     0   :  { %v783_v1 = vmov 1   ;;  %v784_v2 = vmov 0   ;;  %s1213_s0 = inlined_call_operand.vmem [shape: f32[4,128], index: 0, kind: input, shape index: {}]   ;;  %s1214_s1 = inlined_call_operand.vmem [shape: f32[32,4], index: 1, kind: input, shape index: {}]   ;;  %s1215_s2 = inlined_call_operand.vmem [shape: bf16[32,32], index: 2, kind: input, shape index: {}]   ;;  %s1216_s3 = inlined_call_operand.vmem [shape: f32[32,1], index: 3, kind: input, shape index: {}]   ;;  %s1217_s4 = inlined_call_operand.hbm [shape: f32[32,128], index: 4, kind: output, shape index: {}]  }
   0x1   :  { %v20_v0 = vld [vmem:[%s1214_s1] sm:$0xff]  ;;  %730 = vset.pattern.permute.xlu1 %v783_v1  ;;  %729 = vset.pattern.permute.xlu0 %v784_v2  ;;  %v21_v3 = vld [vmem:[%s1214_s1 + $0x8] sm:$0xff] }
   0x2   :  { %53 = vperm.xlu1 %730, %v20_v0   ;;  %26 = vperm.xlu0 %729, %v20_v0  }
   0x3   :  { %9 = vsyncpa [#allocation3], 0  ;;  %v23_v4 = vld [vmem:[%s1214_s1 + $0x18] sm:$0xff]  ;;  %v785_v5 = vmov 2   ;;  %v22_v6 = vld [vmem:[%s1214_s1 + $0x10] sm:$0xff]  ;;  %v786_v7 = vmov 3   ;;  %v44_v8 = vlaneseq }
   0x4   :  { %v19_v16 = vld [vmem:[%s1213_s0] sm:$0xf]  ;;  %vm592_vm1 = vcmask 261120   ;;  %s793_s8 = smov [#allocation2]  }
   0x5   :  { %v45_v11 = vshrl.u32 %v44_v8, 7  ;;  %v741_v63 = vld [vmem:[%s1215_s2] sm:$0xff]   ;;  %s657_s9 = sshll.u32 %s793_s8, 4  ;;  %s658_s9 = int_to_ptr.vmem [resolvable:$true] %s657_s9 }
   0x6   :  { %57 = vperm.xlu1 %730, %v21_v3   ;;  %31 = vperm.xlu0 %729, %v21_v3   ;;  %v558_v8 = vld [vmem:[%s1216_s3] sm:$0xff]  ;;  %p764_p1 = scmp.lt.s32.totalorder %s658_s9, %s658_s9 }
   0x7   :  { %v70_v14 = vsub.s32 1, %v45_v11  ;;  %v46_v15 = vsub.s32 0, %v45_v11  ;;  %v126_v21 = vsub.s32 3, %v45_v11  ;;  %v98_v22 = vsub.s32 2, %v45_v11  ;;  %696 = vmatprep.mubr.msk.bf16.mxu0 %vm592_vm1, %v741_v63 }
   0x9   :  { %v71_v19 = vrot.slane %v19_v16, %v70_v14  ;;  %v47_v20 = vrot.slane %v19_v16, %v46_v15  ;;  %v836_v27 = vrot.slane %v19_v16, %v126_v21  ;;  %v99_v28 = vrot.slane %v19_v16, %v98_v22  ;;  %v560_v16 = vld [vmem:[%s1216_s3 + $0x10] sm:$0xff] }
   0xa   :  { %731 = vset.pattern.permute.xlu1 %v785_v5  ;;  %41 = vperm.xlu0 %729, %v23_v4   ;;  %v788_v21 = vmov 2475754826  }
   0xb   :  { %85 = vperm.xlu1 %731, %v21_v3  }
   0xe   :  { %734 = vset.pattern.permute.xlu0 %v786_v7 }
   0xf   :  { %732 = vset.pattern.permute.xlu1 %v784_v2  ;;  %109 = vperm.xlu0 %734, %v20_v0  }
  0x10   :  { %36 = vperm.xlu1 %732, %v22_v6  }
  0x13   :  { %735 = vset.pattern.permute.xlu0 %v785_v5 }
  0x14   :  { %733 = vset.pattern.permute.xlu1 %v783_v1  ;;  %81 = vperm.xlu0 %735, %v20_v0  }
  0x15   :  { %61 = vperm.xlu1 %733, %v22_v6  }
  0x18   :  { %93 = vperm.xlu0 %735, %v23_v4  }
  0x19   :  { %65 = vperm.xlu1 %733, %v23_v4  }
  0x1c   :  { %739 = vset.pattern.permute.xlu0 %v784_v2 }
  0x1d   :  { %736 = vset.pattern.permute.xlu1 %v786_v7  ;;  %564 = vperm.xlu0 %739, %v558_v8  }
  0x1e   :  { %113 = vperm.xlu1 %736, %v21_v3  }
  0x22   :  { %737 = vset.pattern.permute.xlu1 %v785_v5 }
  0x23   :  { %89 = vperm.xlu1 %737, %v22_v6  }
  0x27   :  { %738 = vset.pattern.permute.xlu1 %v786_v7  ;;  %v559_v7 = vld [vmem:[%s1216_s3 + $0x8] sm:$0xff] }
  0x28   :  { %117 = vperm.xlu1 %738, %v22_v6  }
  0x2c   :  { %121 = vperm.xlu1 %738, %v23_v4  }
  0x30   :  { %740 = vset.pattern.permute.xlu1 %v784_v2 }
  0x31   :  { %569 = vperm.xlu1 %740, %v559_v7  }
  0x35   :  { %574 = vperm.xlu1 %740, %v560_v16  }
  0x81   :  { %v54_v9 = vpop.permute.xlu1 %53  ;;  %v27_v10 = vpop.permute.xlu0 %26 }
  0x82   :  { %v72_v25 = vmul.f32 %v71_v19, %v54_v9  ;;  %v48_v26 = vmul.f32 %v47_v20, %v27_v10 }
  0x84   :  { %v76_v30 = vadd.f32 %v72_v25, %v48_v26  ;;  %v789_v26 = vmov 2131351028  }
  0x85   :  { %v58_v12 = vpop.permute.xlu1 %57  ;;  %v32_v13 = vpop.permute.xlu0 %31 }
  0x86   :  { %v73_v35 = vmul.f32 %v71_v19, %v58_v12  ;;  %v49_v36 = vmul.f32 %v47_v20, %v32_v13 }
  0x88   :  { %v77_v41 = vadd.f32 %v73_v35, %v49_v36 }
  0x89   :  { %v42_v17 = vpop.permute.xlu0 %41 }
  0x8a   :  { %v86_v18 = vpop.permute.xlu1 %85  ;;  %v51_v56 = vmul.f32 %v47_v20, %v42_v17  ;;  %v561_v17 = vld [vmem:[%s1216_s3 + $0x18] sm:$0xff] }
  0x8b   :  { %v101_v39 = vmul.f32 %v99_v28, %v86_v18  ;;  %579 = vperm.xlu0 %739, %v561_v17  }
  0x8d   :  { %v105_v45 = vadd.f32 %v101_v39, %v77_v41 }
  0x8e   :  { %v110_v23 = vpop.permute.xlu0 %109 }
  0x8f   :  { %v37_v24 = vpop.permute.xlu1 %36  ;;  %v128_v31 = vmul.f32 %v836_v27, %v110_v23 }
  0x90   :  { %v50_v57 = vmul.f32 %v47_v20, %v37_v24 }
  0x93   :  { %v82_v29 = vpop.permute.xlu0 %81 }
  0x94   :  { %v100_v32 = vmul.f32 %v99_v28, %v82_v29  ;;  %v62_v33 = vpop.permute.xlu1 %61 }
  0x95   :  { %v74_v53 = vmul.f32 %v71_v19, %v62_v33 }
  0x96   :  { %v104_v34 = vadd.f32 %v100_v32, %v76_v30  ;;  %v790_v32 = vmov 2102212464  }
  0x97   :  { %v94_v51 = vpop.permute.xlu0 %93  ;;  %v78_v4 = vadd.f32 %v74_v53, %v50_v57 }
  0x98   :  { %v839_v37 = vadd.f32 %v128_v31, %v104_v34  ;;  %v66_v38 = vpop.permute.xlu1 %65  ;;  %v103_v60 = vmul.f32 %v99_v28, %v94_v51  ;;  %v791_v34 = vmov 920167782  }
  0x99   :  { %v75_v50 = vmul.f32 %v71_v19, %v66_v38  ;;  %v787_v19 = vmov 683565275  }
  0x9a   :  { %v139_v40 = vand.u32 2139095040, %v839_v37  ;;  %v136_v44 = vand.u32 2147483647, %v839_v37 }
  0x9b   :  { %v79_v0 = vadd.f32 %v75_v50, %v51_v56 }
  0x9c   :  { %v140_v42 = vshrl.u32 %v139_v40, 23  ;;  %v143_v52 = vand.u32 8388607, %v136_v44  ;;  %v792_v40 = vmov 1326507024  }
  0x9d   :  { %v114_v43 = vpop.permute.xlu1 %113  ;;  %v107_v13 = vadd.f32 %v103_v60, %v79_v0 }
  0x9e   :  { %v668_v46 = vadd.s32 4294967169, %v140_v42  ;;  %v129_v47 = vmul.f32 %v836_v27, %v114_v43  ;;  %v144_v1 = vor.u32 8388608, %v143_v52 }
  0xa0   :  { %v146_v48 = vadd.s32 1, %v668_v46  ;;  %v844_v49 = vadd.f32 %v129_v47, %v105_v45  ;;  %v863_v14 = vshll.u32 %v144_v1, 8 }
  0xa2   :  { %vm147_vm0 = vcmp.gt.s32.totalorder %v146_v48, 0  ;;  %v243_v54 = vand.u32 2139095040, %v844_v49  ;;  %v90_v55 = vpop.permute.xlu1 %89  ;;  %v240_v2 = vand.u32 2147483647, %v844_v49 }
  0xa3   :  { %v148_v58 = vsel %vm147_vm0, %v146_v48, 0  ;;  %v102_v62 = vmul.f32 %v99_v28, %v90_v55 }
  0xa4   :  { %v150_v59 = vand.u32 31, %v148_v58  ;;  %v244_v61 = vshrl.u32 %v243_v54, 23  ;;  %v861_v12 = vshrl.u32 %v148_v58, 5  ;;  %v867_v15 = vand.u32 8388607, %v240_v2 }
  0xa5   :  { %v106_v10 = vadd.f32 %v102_v62, %v78_v4 }
  0xa6   :  { %v151_v3 = vsub.s32 32, %v150_v59  ;;  %v672_v5 = vadd.s32 4294967169, %v244_v61  ;;  %v153_v20 = vshll.u32 %v787_v19, %v150_v59  ;;  %v156_v25 = vshll.u32 %v788_v21, %v150_v59 }
  0xa7   :  { %v118_v6 = vpop.permute.xlu1 %117  ;;  %v159_v29 = vshll.u32 %v789_v26, %v150_v59  ;;  %v162_v39 = vshll.u32 %v790_v32, %v150_v59  ;;  %v165_v45 = vshll.u32 %v791_v34, %v150_v59  ;;  %vm168_vm3 = vcmp.lt.s32.totalorder %v861_v12, 1 }
  0xa8   :  { %v250_v9 = vadd.s32 1, %v672_v5  ;;  %v130_v11 = vmul.f32 %v836_v27, %v118_v6  ;;  %v154_v22 = vshrl.u32 %v788_v21, %v151_v3  ;;  %v157_v28 = vshrl.u32 %v789_v26, %v151_v3 }
  0xa9   :  { %v160_v33 = vshrl.u32 %v790_v32, %v151_v3  ;;  %v163_v35 = vshrl.u32 %v791_v34, %v151_v3  ;;  %v166_v41 = vshrl.u32 %v792_v40, %v151_v3  ;;  %v152_v42 = vshrl.u32 %v787_v19, %v151_v3 }
  0xaa   :  { %vm251_vm2 = vcmp.gt.s32.totalorder %v250_v9, 0  ;;  %v875_v18 = vadd.f32 %v130_v11, %v106_v10  ;;  %v155_v43 = vor.u32 %v154_v22, %v153_v20  ;;  %vm169_vm4 = vcmp.lt.s32.totalorder %v861_v12, 2 }
  0xab   :  { %v252_v23 = vsel %vm251_vm2, %v250_v9, 0  ;;  %v122_v24 = vpop.permute.xlu1 %121  ;;  %v158_v51 = vor.u32 %v157_v28, %v156_v25  ;;  %v161_v52 = vor.u32 %v160_v33, %v159_v29  ;;  %v164_v53 = vor.u32 %v163_v35, %v162_v39 }
  0xac   :  { %v882_v30 = vand.u32 31, %v252_v23  ;;  %v344_v31 = vand.u32 2147483647, %v875_v18  ;;  %v347_v36 = vand.u32 2139095040, %v875_v18  ;;  %v131_v38 = vmul.f32 %v836_v27, %v122_v24 }
  0xad   :  { %v902_v50 = vshrl.u32 %v252_v23, 5  ;;  %v167_v56 = vor.u32 %v166_v41, %v165_v45  ;;  %vm170_vm5 = vcmp.lt.s32.totalorder %v861_v12, 3  ;;  %vm171_vm6 = vcmp.lt.s32.totalorder %v861_v12, 4 }
  0xae   :  { %v895_v46 = vsub.s32 32, %v882_v30  ;;  %v348_v47 = vshrl.u32 %v347_v36, 23  ;;  %v351_v48 = vand.u32 8388607, %v344_v31  ;;  %v899_v27 = vadd.f32 %v131_v38, %v107_v13 }
  0xaf   :  { %v908_v57 = vshll.u32 %v790_v32, %v882_v30  ;;  %v912_v58 = vshll.u32 %v791_v34, %v882_v30  ;;  %v928_v3 = vsel %vm168_vm3, %v152_v42, %v155_v43  ;;  %v173_v4 = vsel %vm171_vm6, %v161_v52, 2102212464 }
  0xb0   :  { %v676_v54 = vadd.s32 4294967169, %v348_v47  ;;  %v448_v55 = vand.u32 2147483647, %v899_v27  ;;  %v451_v59 = vand.u32 2139095040, %v899_v27  ;;  %v918_v60 = vshrl.u32 %v791_v34, %v895_v46 }
  0xb1   :  { %v352_v61 = vor.u32 8388608, %v351_v48  ;;  %v924_v0 = vshrl.u32 %v792_v40, %v895_v46  ;;  %v176_v6 = vsel %vm168_vm3, %v155_v43, %v158_v51  ;;  %v177_v7 = vsel %vm171_vm6, %v164_v53, 920167782 }
  0xb2   :  { %v354_v62 = vadd.s32 1, %v676_v54  ;;  %v455_v63 = vand.u32 8388607, %v448_v55  ;;  %v452_v1 = vshrl.u32 %v451_v59, 23  ;;  %v178_v10 = vsel %vm170_vm5, %v161_v52, %v177_v7 }
  0xb3   :  { %v181_v11 = vsel %vm171_vm6, %v167_v56, 1326507024  ;;  %v940_v17 = vshll.u32 %v352_v61, 8  ;;  %v944_v20 = vsel %vm170_vm5, %v158_v51, %v173_v4  ;;  %v950_v24 = vsel %vm169_vm4, %v176_v6, %v178_v10 }
  0xb4   :  { %vm355_vm7 = vcmp.gt.s32.totalorder %v354_v62, 0  ;;  %v456_v5 = vor.u32 8388608, %v455_v63  ;;  %v680_v9 = vadd.s32 4294967169, %v452_v1  ;;  %v180_v25 = vsel %vm168_vm3, %v158_v51, %v161_v52 }
  0xb5   :  { %v356_v8 = vsel %vm355_vm7, %v354_v62, 0  ;;  %v182_v35 = vsel %vm170_vm5, %v164_v53, %v181_v11  ;;  %vm275_vm3 = vcmp.lt.s32.totalorder %v902_v50, 4  ;;  %v268_v12 = vor.u32 %v918_v60, %v908_v57 }
  0xb6   :  { %v357_v13 = vshrl.u32 %v356_v8, 5  ;;  %v358_v16 = vand.u32 31, %v356_v8  ;;  %v458_v22 = vadd.s32 1, %v680_v9  ;;  %v946_v23 = vshll.u32 %v456_v5, 8 }
  0xb7   :  { %v264_v60 = vshrl.u32 %v790_v32, %v895_v46  ;;  %vm272_vm6 = vcmp.lt.s32.totalorder %v902_v50, 1  ;;  %vm273_vm7 = vcmp.lt.s32.totalorder %v902_v50, 2 }
  0xb8   :  { %v359_v28 = vsub.s32 32, %v358_v16  ;;  %v361_v29 = vshll.u32 %v787_v19, %v358_v16  ;;  %v364_v33 = vshll.u32 %v788_v21, %v358_v16  ;;  %v367_v36 = vshll.u32 %v789_v26, %v358_v16 }
  0xb9   :  { %v370_v38 = vshll.u32 %v790_v32, %v358_v16  ;;  %v373_v39 = vshll.u32 %v791_v34, %v358_v16  ;;  %vm376_vm8 = vcmp.lt.s32.totalorder %v357_v13, 1  ;;  %vm377_vm9 = vcmp.lt.s32.totalorder %v357_v13, 2 }
  0xba   :  { %v362_v41 = vshrl.u32 %v788_v21, %v359_v28  ;;  %v365_v42 = vshrl.u32 %v789_v26, %v359_v28  ;;  %v368_v43 = vshrl.u32 %v790_v32, %v359_v28  ;;  %v360_v45 = vshrl.u32 %v787_v19, %v359_v28 }
  0xbb   :  { %v371_v47 = vshrl.u32 %v791_v34, %v359_v28  ;;  %v374_v48 = vshrl.u32 %v792_v40, %v359_v28  ;;  %vm378_vm10 = vcmp.lt.s32.totalorder %v357_v13, 3  ;;  %vm459_vm11 = vcmp.gt.s32.totalorder %v458_v22, 0 }
  0xbc   :  { %v363_v51 = vor.u32 %v362_v41, %v361_v29  ;;  %v366_v52 = vor.u32 %v365_v42, %v364_v33  ;;  %v369_v53 = vor.u32 %v368_v43, %v367_v36  ;;  %vm379_vm12 = vcmp.lt.s32.totalorder %v357_v13, 4 }
  0xbd   :  { %v372_v54 = vor.u32 %v371_v47, %v370_v38  ;;  %v375_v56 = vor.u32 %v374_v48, %v373_v39  ;;  %v460_v59 = vsel %vm459_vm11, %v458_v22, 0  ;;  %v183_v13 = vsel %vm169_vm4, %v180_v25, %v182_v35 }
  0xbe   :  { %v380_v61 = vsel %vm376_vm8, %v360_v45, %v363_v51  ;;  %v381_v62 = vsel %vm379_vm12, %v369_v53, 2102212464  ;;  %v384_v63 = vsel %vm376_vm8, %v363_v51, %v366_v52  ;;  %v388_v1 = vsel %vm376_vm8, %v366_v52, %v369_v53 }
  0xbf   :  { %v382_v4 = vsel %vm378_vm10, %v366_v52, %v381_v62  ;;  %v385_v5 = vsel %vm379_vm12, %v372_v54, 920167782  ;;  %v389_v6 = vsel %vm379_vm12, %v375_v56, 1326507024  ;;  %v461_v7 = vshrl.u32 %v460_v59, 5 }
  0xc0   :  { %v383_v8 = vsel %vm377_vm9, %v380_v61, %v382_v4  ;;  %v386_v9 = vsel %vm378_vm10, %v369_v53, %v385_v5  ;;  %v390_v10 = vsel %vm378_vm10, %v372_v54, %v389_v6  ;;  %v462_v11 = vand.u32 31, %v460_v59 }
  0xc1   :  { %v387_v16 = vsel %vm377_vm9, %v384_v63, %v386_v9  ;;  %v391_v22 = vsel %vm377_vm9, %v388_v1, %v390_v10  ;;  %v978_v28 = vmul.u32.u64.low %v863_v14, %v950_v24  ;;  %v979_v29 = vmul.u32.u64.high %v863_v14, %v950_v24, %v978_v28 }
  0xc2   :  { %v983_v33 = vmul.u32.u64.low %v940_v17, %v391_v22  ;;  %v984_v36 = vmul.u32.u64.high %v940_v17, %v391_v22, %v983_v33  ;;  %v987_v38 = vmul.u32.u64.low %v940_v17, %v387_v16  ;;  %v988_v39 = vmul.u32.u64.high %v940_v17, %v387_v16, %v987_v38 }
  0xc3   :  { %v399_v41 = vmul.u32 %v940_v17, %v383_v8  ;;  %v463_v42 = vsub.s32 32, %v462_v11  ;;  %vm480_vm13 = vcmp.lt.s32.totalorder %v461_v7, 1  ;;  %v465_v24 = vshll.u32 %v787_v19, %v462_v11 }
  0xc4   :  { %v468_v43 = vshll.u32 %v788_v21, %v462_v11  ;;  %v471_v45 = vshll.u32 %v789_v26, %v462_v11  ;;  %v474_v47 = vshll.u32 %v790_v32, %v462_v11  ;;  %v477_v17 = vshll.u32 %v791_v34, %v462_v11 }
  0xc5   :  { %v466_v48 = vshrl.u32 %v788_v21, %v463_v42  ;;  %v469_v51 = vshrl.u32 %v789_v26, %v463_v42  ;;  %v472_v52 = vshrl.u32 %v790_v32, %v463_v42  ;;  %vm401_vm14 = vc.u32 %v984_v36, %v987_v38 }
  0xc6   :  { %v402_v25 = vadd.s32 1, %v988_v39  ;;  %v464_v35 = vshrl.u32 %v787_v19, %v463_v42  ;;  %v475_v53 = vshrl.u32 %v791_v34, %v463_v42  ;;  %v478_v61 = vshrl.u32 %v792_v40, %v463_v42 }
  0xc7   :  { %v467_v54 = vor.u32 %v466_v48, %v465_v24  ;;  %v470_v56 = vor.u32 %v469_v51, %v468_v43  ;;  %v473_v59 = vor.u32 %v472_v52, %v471_v45  ;;  %vm482_vm15 = vcmp.lt.s32.totalorder %v461_v7, 3 }
  0xc8   :  { %v403_v62 = vsel %vm401_vm14, %v402_v25, %v988_v39  ;;  %v476_v63 = vor.u32 %v475_v53, %v474_v47  ;;  %vm483_vm0 = vcmp.lt.s32.totalorder %v461_v7, 4  ;;  %v479_v4 = vor.u32 %v478_v61, %v477_v17 }
  0xc9   :  { %v404_v1 = vadd.s32 %v403_v62, %v399_v41  ;;  %v484_v5 = vsel %vm480_vm13, %v464_v35, %v467_v54  ;;  %v485_v6 = vsel %vm483_vm0, %v473_v59, 2102212464  ;;  %v488_v9 = vsel %vm480_vm13, %v467_v54, %v470_v56 }
  0xca   :  { %v486_v8 = vsel %vm482_vm15, %v470_v56, %v485_v6  ;;  %v489_v34 = vsel %vm483_vm0, %v476_v63, 920167782  ;;  %v492_v10 = vsel %vm480_vm13, %v470_v56, %v473_v59  ;;  %vm481_vm2 = vcmp.lt.s32.totalorder %v461_v7, 2 }
  0xcb   :  { %v405_v11 = vadd.s32 536870912, %v404_v1  ;;  %v490_v40 = vsel %vm482_vm15, %v473_v59, %v489_v34  ;;  %v493_v16 = vsel %vm483_vm0, %v479_v4, 1326507024  ;;  %v487_v22 = vsel %vm481_vm2, %v484_v5, %v486_v8 }
  0xcc   :  { %v491_v33 = vsel %vm481_vm2, %v488_v9, %v490_v40  ;;  %v494_v39 = vsel %vm482_vm15, %v476_v63, %v493_v16  ;;  %v175_v41 = vsel %vm169_vm4, %v928_v3, %v944_v20  ;;  %v271_v3 = vor.u32 %v924_v0, %v912_v58 }
  0xcd   :  { %v1020_v42 = vshrl.u32 %v405_v11, 30  ;;  %v495_v24 = vsel %vm481_vm2, %v492_v10, %v494_v39  ;;  %v1023_v43 = vmul.u32.u64.low %v946_v23, %v491_v33  ;;  %v1024_v45 = vmul.u32.u64.high %v946_v23, %v491_v33, %v1023_v43 }
  0xce   :  { %v1028_v47 = vmul.u32.u64.low %v946_v23, %v495_v24  ;;  %v1029_v48 = vmul.u32.u64.high %v946_v23, %v495_v24, %v1028_v47  ;;  %v1032_v7 = vmul.u32.u64.low %v863_v14, %v183_v13  ;;  %v1033_v51 = vmul.u32.u64.high %v863_v14, %v183_v13, %v1032_v7 }
  0xcf   :  { %v407_v20 = vshll.u32 %v1020_v42, 30  ;;  %v194_v52 = vadd.s32 1, %v979_v29  ;;  %v503_v17 = vmul.u32 %v946_v23, %v487_v22  ;;  %v191_v25 = vmul.u32 %v863_v14, %v175_v41 }
  0xd0   :  { %v258_v35 = vshrl.u32 %v788_v21, %v895_v46  ;;  %v261_v13 = vshrl.u32 %v789_v26, %v895_v46  ;;  %v506_v57 = vadd.s32 1, %v1024_v45  ;;  %v257_v58 = vshll.u32 %v787_v19, %v882_v30 }
  0xd1   :  { %v1047_v53 = vsub.s32 %v404_v1, %v407_v20  ;;  %vm505_vm4 = vc.u32 %v1029_v48, %v1023_v43  ;;  %vm193_vm5 = vc.u32 %v1033_v51, %v978_v28  ;;  %v260_v14 = vshll.u32 %v788_v21, %v882_v30 }
  0xd2   :  { %v263_v0 = vshll.u32 %v789_v26, %v882_v30  ;;  %v507_v54 = vsel %vm505_vm4, %v506_v57, %v1024_v45  ;;  %v195_v56 = vsel %vm193_vm5, %v194_v52, %v979_v29  ;;  %v259_v59 = vor.u32 %v258_v35, %v257_v58 }
  0xd3   :  { %v410_v23 = vsub.s32 0, %v1047_v53  ;;  %v508_v32 = vadd.s32 %v507_v54, %v503_v17  ;;  %v196_v61 = vadd.s32 %v195_v56, %v191_v25  ;;  %v262_v62 = vor.u32 %v261_v13, %v260_v14 }
  0xd4   :  { %v265_v63 = vor.u32 %v264_v60, %v263_v0  ;;  %v281_v1 = vsel %vm275_vm3, %v268_v12, 920167782  ;;  %v248_v21 = vor.u32 8388608, %v867_v15  ;;  %v285_v26 = vsel %vm275_vm3, %v271_v3, 1326507024 }
  0xd5   :  { %v677_v4 = vmin.u32 %v410_v23, %v1047_v53  ;;  %v509_v30 = vadd.s32 536870912, %v508_v32  ;;  %v197_v5 = vadd.s32 536870912, %v196_v61  ;;  %vm274_vm8 = vcmp.lt.s32.totalorder %v902_v50, 3 }
  0xd6   :  { %v284_v6 = vsel %vm272_vm6, %v262_v62, %v265_v63  ;;  %v280_v15 = vsel %vm272_vm6, %v259_v59, %v262_v62  ;;  %v282_v10 = vsel %vm274_vm8, %v265_v63, %v281_v1  ;;  %v286_v11 = vsel %vm274_vm8, %v268_v12, %v285_v26 }
  0xd7   :  { %v412_v29 = vclz %v677_v4  ;;  %v1075_v8 = vshrl.u32 %v509_v30, 30  ;;  %v1077_v9 = vshrl.u32 %v197_v5, 30  ;;  %v288_v40 = vshll.u32 %v248_v21, 8 }
  0xd8   :  { %v256_v33 = vshrl.u32 %v787_v19, %v895_v46  ;;  %v287_v39 = vsel %vm273_vm7, %v284_v6, %v286_v11  ;;  %v277_v41 = vsel %vm275_vm3, %v265_v63, 2102212464  ;;  %v283_v3 = vsel %vm273_vm7, %v280_v15, %v282_v10 }
  0xd9   :  { %v678_v34 = vadd.s32 4294967294, %v412_v29  ;;  %v511_v16 = vshll.u32 %v1075_v8, 30  ;;  %v199_v22 = vshll.u32 %v1077_v9, 30  ;;  %v278_v46 = vsel %vm274_vm8, %v262_v62, %v277_v41 }
  0xda   :  { %v1094_v24 = vmul.u32.u64.low %v288_v40, %v287_v39  ;;  %v1095_v45 = vmul.u32.u64.high %v288_v40, %v287_v39, %v1094_v24  ;;  %v276_v19 = vsel %vm272_vm6, %v256_v33, %v259_v59  ;;  %v400_v54 = vadd.s32 %v987_v38, %v984_v36 }
  0xdb   :  { %vm679_vm9 = vcmp.lt.s32.totalorder %v678_v34, 0  ;;  %v512_v7 = vsub.s32 %v508_v32, %v511_v16  ;;  %v200_v12 = vsub.s32 %v196_v61, %v199_v22  ;;  %v279_v60 = vsel %vm273_vm7, %v276_v19, %v278_v46 }
  0xdc   :  { %v415_v47 = vsel %vm679_vm9, 0, %v678_v34  ;;  %v1103_v25 = vmul.u32.u64.low %v288_v40, %v283_v3  ;;  %v1104_v35 = vmul.u32.u64.high %v288_v40, %v283_v3, %v1103_v25  ;;  %v295_v62 = vmul.u32 %v288_v40, %v279_v60 }
  0xdd   :  { %v420_v20 = vsub.s32 4294967266, %v415_v47  ;;  %v514_v52 = vsub.s32 0, %v512_v7  ;;  %v202_v17 = vsub.s32 0, %v200_v12  ;;  %v416_v14 = vsub.s32 32, %v415_v47 }
  0xde   :  { %vm297_vm10 = vc.u32 %v1095_v45, %v1103_v25  ;;  %v298_v56 = vadd.s32 1, %v1104_v35  ;;  %v417_v4 = vshll.u32 %v1047_v53, %v415_v47  ;;  %v504_v21 = vadd.s32 %v1023_v43, %v1029_v48 }
  0xdf   :  { %v421_v13 = vadd.s32 127, %v420_v20  ;;  %v681_v57 = vmin.u32 %v514_v52, %v512_v7  ;;  %v669_v58 = vmin.u32 %v202_v17, %v200_v12  ;;  %v418_v1 = vshrl.u32 %v400_v54, %v416_v14 }
  0xe0   :  { %v299_v63 = vsel %vm297_vm10, %v298_v56, %v1104_v35  ;;  %v192_v6 = vadd.s32 %v978_v28, %v1033_v51  ;;  %vm346_vm13 = vcmp.lt.s32.totalorder %v875_v18, 0  ;;  %vm450_vm15 = vcmp.lt.s32.totalorder %v899_v27, 0 }
  0xe1   :  { %v516_v0 = vclz %v681_v57  ;;  %v204_v23 = vclz %v669_v58  ;;  %v422_v59 = vshll.u32 %v421_v13, 23  ;;  %v300_v50 = vadd.s32 %v299_v63, %v295_v62 }
  0xe2   :  { %v419_v10 = vor.u32 %v418_v1, %v417_v4  ;;  %vm1129_vm0 = vcmp.le.f32.partialorder %v344_v31, 0.7853982  ;;  %v296_v62 = vadd.s32 %v1103_v25, %v1095_v45  ;;  %vm138_vm2 = vcmp.lt.s32.totalorder %v839_v37, 0 }
  0xe3   :  { %v682_v32 = vadd.s32 4294967294, %v516_v0  ;;  %v670_v61 = vadd.s32 4294967294, %v204_v23  ;;  %v423_v36 = vor.u32 4788187, %v422_v59  ;;  %v301_v34 = vadd.s32 536870912, %v300_v50 }
  0xe4   :  { %v426_v20 = vcvt.s32.f32 %v419_v10  ;;  %vm1143_vm3 = vcmp.le.f32.partialorder %v448_v55, 0.7853982  ;;  %vm1154_vm4 = vcmp.le.f32.partialorder %v136_v44, 0.7853982  ;;  %vm242_vm5 = vcmp.lt.s32.totalorder %v844_v49, 0 }
  0xe5   :  { %vm683_vm11 = vcmp.lt.s32.totalorder %v682_v32, 0  ;;  %vm671_vm12 = vcmp.lt.s32.totalorder %v670_v61, 0  ;;  %v1120_v33 = vshrl.u32 %v301_v34, 30  ;;  %v424_v43 = vand.u32 2147483647, %v423_v36 }
  0xe6   :  { %v519_v26 = vsel %vm683_vm11, 0, %v682_v32  ;;  %v207_v30 = vsel %vm671_vm12, 0, %v670_v61  ;;  %vm1181_vm6 = vcmp.le.f32.partialorder %v240_v2, 0.7853982 }
  0xe7   :  { %v520_v38 = vsub.s32 32, %v519_v26  ;;  %v524_v5 = vsub.s32 4294967266, %v519_v26  ;;  %v208_v29 = vsub.s32 32, %v207_v30  ;;  %v212_v15 = vsub.s32 4294967266, %v207_v30 }
  0xe8   :  { %v521_v16 = vshll.u32 %v512_v7, %v519_v26  ;;  %v209_v41 = vshll.u32 %v200_v12, %v207_v30  ;;  %v303_v47 = vshll.u32 %v1120_v33, 30  ;;  %v427_v19 = vmul.f32 %v426_v20, %v424_v43 }
  0xe9   :  { %v522_v11 = vshrl.u32 %v504_v21, %v520_v38  ;;  %v525_v40 = vadd.s32 127, %v524_v5  ;;  %v210_v22 = vshrl.u32 %v192_v6, %v208_v29  ;;  %v213_v53 = vadd.s32 127, %v212_v15 }
  0xea   :  { %v304_v52 = vsub.s32 %v300_v50, %v303_v47  ;;  %v428_v60 = vxor.u32 2147483648, %v427_v19  ;;  %v534_v5 = vsub.s32 4, %v1075_v8  ;;  %v222_v29 = vsub.s32 4, %v1077_v9 }
  0xeb   :  { %v526_v48 = vshll.u32 %v525_v40, 23  ;;  %v523_v39 = vor.u32 %v522_v11, %v521_v16  ;;  %v214_v24 = vshll.u32 %v213_v53, 23  ;;  %v211_v28 = vor.u32 %v210_v22, %v209_v41 }
  0xec   :  { %v306_v35 = vsub.s32 0, %v304_v52  ;;  %v429_v54 = vsel %vm346_vm13, %v428_v60, %v427_v19  ;;  %v430_v15 = vsub.s32 4, %v1020_v42  ;;  %v535_v10 = vsel %vm450_vm15, %v534_v5, %v1075_v8 }
  0xed   :  { %v527_v3 = vor.u32 4788187, %v526_v48  ;;  %v215_v51 = vor.u32 4788187, %v214_v24  ;;  %v530_v46 = vcvt.s32.f32 %v523_v39  ;;  %v218_v57 = vcvt.s32.f32 %v211_v28 }
  0xee   :  { %v673_v58 = vmin.u32 %v306_v35, %v304_v52  ;;  %v432_v50 = vsel %vm1129_vm0, %v875_v18, %v429_v54  ;;  %v223_v11 = vsel %vm138_vm2, %v222_v29, %v1077_v9  ;;  %v326_v16 = vsub.s32 4, %v1120_v33 }
  0xef   :  { %v528_v17 = vand.u32 2147483647, %v527_v3  ;;  %v216_v7 = vand.u32 2147483647, %v215_v51  ;;  %743 = vcosq.f32 %v432_v50  ;;  %v431_v22 = vsel %vm346_vm13, %v430_v15, %v1020_v42 }
  0xf0   :  { %v308_v0 = vclz %v673_v58  ;;  %745 = vsinq.f32 %v432_v50  ;;  %v537_v43 = vsel %vm1143_vm3, 0, %v535_v10  ;;  %v225_v48 = vsel %vm1154_vm4, 0, %v223_v11 }
  0xf1   :  { %v531_v13 = vmul.f32 %v530_v46, %v528_v17  ;;  %v219_v14 = vmul.f32 %v218_v57, %v216_v7  ;;  %v327_v41 = vsel %vm242_vm5, %v326_v16, %v1120_v33  ;;  %v433_v42 = vsel %vm1129_vm0, 0, %v431_v22 }
  0xf2   :  { %v674_v23 = vadd.s32 4294967294, %v308_v0  ;;  %v541_v3 = vadd.s32 3, %v537_v43  ;;  %v229_v28 = vadd.s32 3, %v225_v48  ;;  %v329_v2 = vsel %vm1181_vm6, 0, %v327_v41 }
  0xf3   :  { %v532_v12 = vxor.u32 2147483648, %v531_v13  ;;  %v220_v56 = vxor.u32 2147483648, %v219_v14  ;;  %v333_v7 = vadd.s32 3, %v329_v2 }
  0xf4   :  { %vm675_vm14 = vcmp.lt.s32.totalorder %v674_v23, 0  ;;  %v542_v19 = vand.u32 3, %v541_v3  ;;  %v230_v46 = vand.u32 3, %v229_v28 }
  0xf5   :  { %v311_v59 = vsel %vm675_vm14, 0, %v674_v23  ;;  %v533_v61 = vsel %vm450_vm15, %v532_v12, %v531_v13  ;;  %v221_v4 = vsel %vm138_vm2, %v220_v56, %v219_v14  ;;  %v334_v12 = vand.u32 3, %v333_v7 }
  0xf6   :  { %v312_v63 = vsub.s32 32, %v311_v59  ;;  %v316_v1 = vsub.s32 4294967266, %v311_v59  ;;  %v313_v21 = vshll.u32 %v304_v52, %v311_v59  ;;  %v536_v25 = vsel %vm1143_vm3, %v899_v27, %v533_v61 }
  0xf7   :  { %v224_v38 = vsel %vm1154_vm4, %v839_v37, %v221_v4  ;;  %747 = vcosq.f32 %v536_v25  ;;  %v437_v52 = vadd.s32 3, %v433_v42  ;;  %vm544_vm7 = vcmp.eq.s32.totalorder %v542_v19, 0 }
  0xf8   :  { %v314_v26 = vshrl.u32 %v296_v62, %v312_v63  ;;  %v317_v45 = vadd.s32 127, %v316_v1  ;;  %749 = vsinq.f32 %v536_v25  ;;  %vm547_vm8 = vcmp.eq.s32.totalorder %v542_v19, 2 }
  0xf9   :  { %751 = vcosq.f32 %v224_v38  ;;  %v744_v8 = vpop.eup %743  ;;  %v438_v57 = vand.u32 3, %v437_v52  ;;  %vm232_vm9 = vcmp.eq.s32.totalorder %v230_v46, 0  ;;  %vm235_vm10 = vcmp.eq.s32.totalorder %v230_v46, 2 }
  0xfa   :  { %v315_v55 = vor.u32 %v314_v26, %v313_v21  ;;  %v318_v36 = vshll.u32 %v317_v45, 23  ;;  %753 = vsinq.f32 %v224_v38  ;;  %v746_v24 = vpop.eup %745  ;;  %v444_v0 = vxor.u32 2147483648, %v744_v8 }
  0xfb   :  { %v441_v14 = vxor.u32 2147483648, %v746_v24  ;;  %vm440_vm11 = vcmp.eq.s32.totalorder %v438_v57, 0  ;;  %vm443_vm12 = vcmp.eq.s32.totalorder %v438_v57, 2  ;;  %vm543_vm13 = vcmp.lt.s32.totalorder %v542_v19, 2 }
  0xfc   :  { %v319_v6 = vor.u32 4788187, %v318_v36  ;;  %v322_v34 = vcvt.s32.f32 %v315_v55  ;;  %v445_v62 = vsel %vm443_vm12, %v444_v0, %v746_v24  ;;  %vm231_vm14 = vcmp.lt.s32.totalorder %v230_v46, 2 }
  0xfd   :  { %v442_v61 = vsel %vm440_vm11, %v744_v8, %v441_v14  ;;  %vm339_vm15 = vcmp.eq.s32.totalorder %v334_v12, 2  ;;  %vm439_vm0 = vcmp.lt.s32.totalorder %v438_v57, 2  ;;  %vm540_vm2 = vweird.f32 %v899_v27  ;;  %v742_v27 = vld [vmem:[%s1215_s2 + $0x8] sm:$0xff]   ;;  %s759_s2 = scalar_lea.vmem %s658_s9, 512 }
  0xfe   :  { %v320_v44 = vand.u32 2147483647, %v319_v6  ;;  %vm336_vm3 = vcmp.eq.s32.totalorder %v334_v12, 0  ;;  %v446_v26 = vsel %vm439_vm0, %v442_v61, %v445_v62  ;;  %vm335_vm4 = vcmp.lt.s32.totalorder %v334_v12, 2  ;;  %p760_p0 = scmp.ne.s32.totalorder %s658_s9, %s759_s2  ;;  %p765_p2 = scmp.lt.s32.totalorder %s759_s2, %s759_s2 }
 0x100   :  { %v323_v40 = vmul.f32 %v322_v34, %v320_v44  ;;  %p766_p3 = por %p765_p2, %p764_p1 }
 0x101   :  { %v748_v20 = vpop.eup %747 }
 0x102   :  { %v324_v53 = vxor.u32 2147483648, %v323_v40  ;;  %v750_v51 = vpop.eup %749  ;;  %v548_v13 = vxor.u32 2147483648, %v748_v20  ;;  %p767_p4 = pnand %p766_p3, %p760_p0 }
 0x103   :  { %v752_v17 = vpop.eup %751  ;;  %v545_v35 = vxor.u32 2147483648, %v750_v51 }
 0x104   :  { %v325_v39 = vsel %vm242_vm5, %v324_v53, %v323_v40  ;;  %v754_v33 = vpop.eup %753  ;;  %v236_v60 = vxor.u32 2147483648, %v752_v17  ;;  %v549_v54 = vsel %vm547_vm8, %v548_v13, %v750_v51  ;;  %vm228_vm5 = vweird.f32 %v839_v37  ;;  %v570_v37 = vpop.permute.xlu1 %569 }
 0x105   :  { %v328_v47 = vsel %vm1181_vm6, %v844_v49, %v325_v39  ;;  %v233_v58 = vxor.u32 2147483648, %v754_v33  ;;  %v546_v23 = vsel %vm544_vm7, %v748_v20, %v545_v35  ;;  %vm332_vm6 = vweird.f32 %v844_v49  ;;  %v565_v49 = vpop.permute.xlu0 %564 }
 0x106   :  { %755 = vcosq.f32 %v328_v47  ;;  %v237_v32 = vsel %vm235_vm10, %v236_v60, %v754_v33  ;;  %v550_v50 = vsel %vm543_vm13, %v546_v23, %v549_v54  ;;  %vm436_vm7 = vweird.f32 %v875_v18 }
 0x107   :  { %757 = vsinq.f32 %v328_v47  ;;  %v234_v59 = vsel %vm232_vm9, %v752_v17, %v233_v58  ;;  %v551_v25 = vsel %vm540_vm2, nan, %v550_v50  ;;  %v447_v38 = vsel %vm436_vm7, nan, %v446_v26 }
 0x108   :  { %v238_v4 = vsel %vm231_vm14, %v234_v59, %v237_v32  ;;  %v557_v29 = vpack.c.bf16 %v551_v25, %v447_v38  ;;  %v575_v6 = vpop.permute.xlu1 %574 }
 0x109   :  { %v239_v55 = vsel %vm228_vm5, nan, %v238_v4 }
 0x10a   :  { %v580_v34 = vpop.permute.xlu0 %579 }
 0x110   :  { %v756_v56 = vpop.eup %755 }
 0x111   :  { %v758_v63 = vpop.eup %757  ;;  %v340_v1 = vxor.u32 2147483648, %v756_v56 }
 0x112   :  { %v337_v31 = vxor.u32 2147483648, %v758_v63 }
 0x113   :  { %v341_v21 = vsel %vm339_vm15, %v340_v1, %v758_v63 }
 0x114   :  { %v338_v45 = vsel %vm336_vm3, %v756_v56, %v337_v31 }
 0x115   :  { %v342_v30 = vsel %vm335_vm4, %v338_v45, %v341_v21 }
 0x116   :  { %v343_v36 = vsel %vm332_vm6, nan, %v342_v30 }
 0x117   :  { %v556_v5 = vpack.c.bf16 %v343_v36, %v239_v55 }
 0x119   :  { %692 = vmatprep.subr.bf16.mxu0 %v556_v5 }
 0x11a   :  { %693 = vmatpush3.bf16.msra.mxu0 %v556_v5 }
 0x11b   :  { %694 = vmatprep.subr.bf16.mxu0 %v557_v29 }
 0x11e   :  { %695 = vmatpush3.bf16.msra.mxu0 %v557_v29 }
 0x121   :  { %697 = vmatmul.mubr.msk.bf16.vlgmr.msra.gmra.mrb[0].mxu0 %vm592_vm1, %v742_v27 }
 0x1f4   :  { %v698_v15 = vpop.f32.mrb[0].mxu0 }
 0x1f5   :  { %v642_v18 = vadd.f32 %v698_v15, %v575_v6  ;;  %v633_v44 = vpop.f32.mrb[1].mxu0 }
 0x1f6   :  { %v634_v10 = vadd.f32 %v633_v44, %v565_v49  ;;  %v699_v11 = vpop.f32.mrb[2].mxu0 }
 0x1f7   :  { %650 = vst [vmem:[#allocation2 + $0x10] sm:$0xff] %v642_v18  ;;  %v645_v40 = vadd.f32 %v699_v11, %v580_v34  ;;  %v636_v16 = vpop.f32.mrb[3].mxu0 }
 0x1f8   :  { %648 = vst [vmem:[#allocation2] sm:$0xff] %v634_v10  ;;  %v637_v22 = vadd.f32 %v636_v16, %v570_v37 }
 0x1f9   :  { %651 = vst [vmem:[#allocation2 + $0x18] sm:$0xff] %v645_v40 }
 0x1fa   :  { %649 = vst [vmem:[#allocation2 + $0x8] sm:$0xff] %v637_v22 }
 0x1fb   :  { %770 = shalt.err (!%p767_p4)
}
 0x1fc   :  { %s771_s12 = scalar_lea.hbm %s1217_s4, 512 }
 0x1fd   :  { %p772_p5 = scmp.ne.s32.totalorder %s1217_s4, %s771_s12  ;;  %p775_p6 = scmp.lt.u32.totalorder %s771_s12, %s1217_s4 }
 0x1ff   :  { %p777_p7 = pnand %p775_p6, %p772_p5 }
 0x201   :  { %780 = shalt.err (!%p777_p7)
}
 0x202   :  { %s794_s17 = smov 128   ;;  %s795_s18 = smov 8  }
 0x203   :  { %663 = dma.vmem_to_hbm [thread:$0]  %s658_s9, 512, %s1217_s4, [#allocation3], %s794_s17, %s794_s17, %s795_s18  }
 0x204   :  { %781 = dma.done.wait [#allocation3], 512  }
 0x205   :  { %782 = vsyncadd [#allocation3], 4294966784 }
 0x206   :  { %667 = vsyncpa [#allocation3], 1 }

</bundles_post_ra>
